<compile_context>
chip_gen: v6e
topology: v6e:2x2x1
jax: 0.10.0
libtpu: 0.0.40
codegen_flags: <defaults>
</compile_context>

<pallas_src>
import jax
import jax.numpy as jnp
from jax.experimental import pallas as pl
from jax.experimental.pallas import tpu as pltpu


def _relora_loss_kernel(scale_ref, a_ref, b_ref, w_ref, la_ref, lb_ref, out_ref):
    k = pl.program_id(0)

    # Zero the resident scalar accumulator on the first reduction step.
    @pl.when(k == 0)
    def _init():
        out_ref[...] = jnp.zeros_like(out_ref)

    # Runtime scalar from SMEM (avoids a recompile per distinct scale value).
    scale = scale_ref[0, 0]

    # weff tile = W_tile - scale * (LA @ LB_tile)   -> (out_f, tile_in), MXU + VPU.
    lora = jnp.dot(la_ref[...], lb_ref[...], preferred_element_type=jnp.float32)
    weff = w_ref[...] - scale * lora

    # tmp tile = A @ weff_tile                      -> (M, tile_in), MXU.
    tmp = jnp.dot(a_ref[...], weff, preferred_element_type=jnp.float32)

    # Per-tile contribution to 0.5*||A@weff||_F^2 + <B, weff>; accumulate in f32.
    contrib = 0.5 * jnp.sum(tmp * tmp) + jnp.sum(b_ref[...] * weff)
    out_ref[...] += contrib


def _pick_in_tile(in_features: int, max_tile_in: int) -> int:
    """Largest multiple-of-128 tile <= max_tile_in that divides in_features."""
    if in_features <= max_tile_in or in_features % 128 != 0:
        return in_features  # single full-width tile (small / ragged widths)
    t = (max_tile_in // 128) * 128
    while t > 128 and in_features % t != 0:
        t -= 128
    return t if in_features % t == 0 else in_features


def relora_forward(A, B, W, LA, LB, scale=1.0, *, max_tile_in=512):
    """Pallas implementation of ReLoRaLinear.forward(A, B) (forward_type=0).

    max_tile_in: in_features tile width.  512 is a good default on v5e/v6e;
    use ~256 on v7x (half the VMEM) once out_features reaches the thousands.
    """
    M, out_f = A.shape
    out_f_w, in_f = W.shape
    assert out_f == out_f_w and B.shape == (out_f, in_f)
    r = LA.shape[1]
    assert LA.shape == (out_f, r) and LB.shape == (r, in_f)

    tile_in = _pick_in_tile(in_f, max_tile_in)
    grid = (in_f // tile_in,)

    scale_arr = jnp.asarray(scale, dtype=jnp.float32).reshape(1, 1)

    # Advisory cost for XLA's scheduler.
    flops = (2 * out_f * r * in_f      # LA @ LB
             + 2 * M * out_f * in_f    # A @ weff
             + 5 * out_f * in_f        # subtract / scale / B*weff / reductions
             + 3 * M * in_f)           # tmp*tmp / reductions
    bytes_accessed = 4 * (A.size + B.size + W.size + LA.size + LB.size + 2)

    out = pl.pallas_call(
        _relora_loss_kernel,
        out_shape=jax.ShapeDtypeStruct((1, 1), jnp.float32),
        grid=grid,
        in_specs=[
            pl.BlockSpec(memory_space=pltpu.MemorySpace.SMEM),    # scale (1,1)
            pl.BlockSpec((M, out_f), lambda k: (0, 0)),           # A (resident)
            pl.BlockSpec((out_f, tile_in), lambda k: (0, k)),     # B tile
            pl.BlockSpec((out_f, tile_in), lambda k: (0, k)),     # W tile
            pl.BlockSpec((out_f, r), lambda k: (0, 0)),           # LA (resident)
            pl.BlockSpec((r, tile_in), lambda k: (0, k)),         # LB tile
        ],
        out_specs=pl.BlockSpec((1, 1), lambda k: (0, 0)),         # resident acc
        compiler_params=pltpu.CompilerParams(
            dimension_semantics=("arbitrary",)),                  # reduction axis
        cost_estimate=pl.CostEstimate(
            flops=flops, transcendentals=0, bytes_accessed=bytes_accessed),
    )(scale_arr, A, B, W, LA, LB)
    return out[0, 0]


if __name__ == "__main__":
    # Module hyperparameters (small, consistent with ReLoRaLinear.__init__).
    M = 8             # batch rows of A
    in_features = 256
    out_features = 64
    r = 8
    scale = 0.5

    key = jax.random.PRNGKey(0)
    k_a, k_b, k_w, k_la, k_lb = jax.random.split(key, 5)

    # Forward inputs.
    A = jax.random.normal(k_a, (M, out_features), dtype=jnp.float32)
    B = jax.random.normal(k_b, (out_features, in_features), dtype=jnp.float32)

    # Parameters. NOTE: torch __init__ zero-initializes weight / lora_A / lora_B,
    # which would give an identically-zero loss; use deterministic small random
    # values so the kernel path is actually exercised.
    W = 0.02 * jax.random.normal(k_w, (out_features, in_features), dtype=jnp.float32)
    LA = 0.02 * jax.random.normal(k_la, (out_features, r), dtype=jnp.float32)
    LB = 0.02 * jax.random.normal(k_lb, (r, in_features), dtype=jnp.float32)
    # TODO(synk): bias / lora_dropout exist in __init__ but are unused in forward().

    out = jax.block_until_ready(relora_forward(A, B, W, LA, LB, scale=scale))

    # Pure-JAX reference check.
    weff_ref = W - scale * (LA @ LB)
    tmp_ref = A @ weff_ref
    ref = 0.5 * jnp.sum(tmp_ref * tmp_ref) + jnp.sum(B * weff_ref)

    assert jnp.allclose(out, ref, rtol=1e-4, atol=1e-4), (out, ref)
    print("KERNEL_OK")
</pallas_src>

<mosaic_0001>
module attributes {stable_mosaic.version = 11 : i64} {
  func.func @_relora_loss_kernel(%arg0: i32, %arg1: memref<1x1xf32, #tpu.memory_space<smem>>, %arg2: memref<8x64xf32, #tpu.memory_space<vmem>>, %arg3: memref<64x256xf32, #tpu.memory_space<vmem>>, %arg4: memref<64x256xf32, #tpu.memory_space<vmem>>, %arg5: memref<64x8xf32, #tpu.memory_space<vmem>>, %arg6: memref<8x256xf32, #tpu.memory_space<vmem>>, %arg7: memref<1x1xf32, #tpu.memory_space<vmem>>) attributes {dimension_semantics = [#tpu.dimension_semantics<arbitrary>], iteration_bounds = array<i64: 1>, scalar_prefetch = 0 : i64, scratch_operands = 0 : i64, tpu.core_type = #tpu.core_type<tc>, window_params = [{transform_indices = @transform_0, window_bounds = array<i64: 1, 1>}, {pipeline_mode = #tpu.pipeline_mode<synchronous>, transform_indices = @transform_1, window_bounds = array<i64: 8, 64>}, {transform_indices = @transform_2, window_bounds = array<i64: 64, 256>}, {transform_indices = @transform_3, window_bounds = array<i64: 64, 256>}, {pipeline_mode = #tpu.pipeline_mode<synchronous>, transform_indices = @transform_4, window_bounds = array<i64: 64, 8>}, {transform_indices = @transform_5, window_bounds = array<i64: 8, 256>}, {pipeline_mode = #tpu.pipeline_mode<synchronous>, transform_indices = @transform_6, window_bounds = array<i64: 1, 1>}]} {
    %c0_i32 = arith.constant 0 : i32
    %0 = arith.cmpi eq, %arg0, %c0_i32 : i32
    %1 = arith.extui %0 : i1 to i32
    %c0_i32_0 = arith.constant 0 : i32
    %2 = arith.cmpi ne, %1, %c0_i32_0 : i32
    scf.if %2 {
      %cst_20 = arith.constant 0.000000e+00 : f32
      %30 = vector.broadcast %cst_20 : f32 to vector<1x1xf32>
      %c0_21 = arith.constant 0 : index
      %c0_22 = arith.constant 0 : index
      %31 = vector.load %arg7[%c0_21, %c0_22] : memref<1x1xf32, #tpu.memory_space<vmem>>, vector<1x1xf32>
      tpu.vector_store %arg7[%c0_21, %c0_22], %30 {strides = array<i32>} : memref<1x1xf32, #tpu.memory_space<vmem>>, vector<1x1xf32>,
    } else {
    }
    %c0 = arith.constant 0 : index
    %c0_1 = arith.constant 0 : index
    %3 = memref.load %arg1[%c0, %c0_1] : memref<1x1xf32, #tpu.memory_space<smem>>
    %c0_2 = arith.constant 0 : index
    %c0_3 = arith.constant 0 : index
    %4 = vector.load %arg5[%c0_2, %c0_3] : memref<64x8xf32, #tpu.memory_space<vmem>>, vector<64x8xf32>
    %c0_4 = arith.constant 0 : index
    %c0_5 = arith.constant 0 : index
    %5 = vector.load %arg6[%c0_4, %c0_5] : memref<8x256xf32, #tpu.memory_space<vmem>>, vector<8x256xf32>
    %cst = arith.constant dense<0.000000e+00> : vector<64x256xf32>
    %6 = tpu.matmul %4, %5, %cst {dimension_numbers = #tpu.dot_dimension_numbers<[1], [0], [0], [1], [0, 0, 1, 1], [], []>} : vector<64x8xf32>, vector<8x256xf32>, vector<64x256xf32> -> vector<64x256xf32>
    %c0_6 = arith.constant 0 : index
    %c0_7 = arith.constant 0 : index
    %7 = vector.load %arg4[%c0_6, %c0_7] : memref<64x256xf32, #tpu.memory_space<vmem>>, vector<64x256xf32>
    %8 = vector.broadcast %3 : f32 to vector<64x256xf32>
    %9 = arith.mulf %8, %6 : vector<64x256xf32>
    %10 = arith.subf %7, %9 : vector<64x256xf32>
    %c0_8 = arith.constant 0 : index
    %c0_9 = arith.constant 0 : index
    %11 = vector.load %arg2[%c0_8, %c0_9] : memref<8x64xf32, #tpu.memory_space<vmem>>, vector<8x64xf32>
    %cst_10 = arith.constant dense<0.000000e+00> : vector<8x256xf32>
    %12 = tpu.matmul %11, %10, %cst_10 {dimension_numbers = #tpu.dot_dimension_numbers<[1], [0], [0], [1], [0, 0, 1, 1], [], []>} : vector<8x64xf32>, vector<64x256xf32>, vector<8x256xf32> -> vector<8x256xf32>
    %13 = arith.mulf %12, %12 : vector<8x256xf32>
    %14 = vector.shape_cast %13 : vector<8x256xf32> to vector<1x8x256xf32>
    %cst_11 = arith.constant dense<0.000000e+00> : vector<1xf32>
    %15 = vector.multi_reduction <add>, %14, %cst_11 [1, 2] : vector<1x8x256xf32> to vector<1xf32>
    %16 = vector.shape_cast %15 : vector<1xf32> to vector<1x1x1xf32>
    %17 = vector.extract %16[0, 0, 0] : f32 from vector<1x1x1xf32>
    %cst_12 = arith.constant 5.000000e-01 : f32
    %18 = arith.mulf %cst_12, %17 : f32
    %c0_13 = arith.constant 0 : index
    %c0_14 = arith.constant 0 : index
    %19 = vector.load %arg3[%c0_13, %c0_14] : memref<64x256xf32, #tpu.memory_space<vmem>>, vector<64x256xf32>
    %20 = arith.mulf %19, %10 : vector<64x256xf32>
    %21 = vector.shape_cast %20 : vector<64x256xf32> to vector<1x64x256xf32>
    %cst_15 = arith.constant dense<0.000000e+00> : vector<1xf32>
    %22 = vector.multi_reduction <add>, %21, %cst_15 [1, 2] : vector<1x64x256xf32> to vector<1xf32>
    %23 = vector.shape_cast %22 : vector<1xf32> to vector<1x1x1xf32>
    %24 = vector.extract %23[0, 0, 0] : f32 from vector<1x1x1xf32>
    %25 = arith.addf %18, %24 : f32
    %c0_16 = arith.constant 0 : index
    %c0_17 = arith.constant 0 : index
    %26 = vector.load %arg7[%c0_16, %c0_17] : memref<1x1xf32, #tpu.memory_space<vmem>>, vector<1x1xf32>
    %27 = vector.broadcast %25 : f32 to vector<1x1xf32>
    %28 = arith.addf %26, %27 : vector<1x1xf32>
    %c0_18 = arith.constant 0 : index
    %c0_19 = arith.constant 0 : index
    %29 = vector.load %arg7[%c0_18, %c0_19] : memref<1x1xf32, #tpu.memory_space<vmem>>, vector<1x1xf32>
    tpu.vector_store %arg7[%c0_18, %c0_19], %28 {strides = array<i32>} : memref<1x1xf32, #tpu.memory_space<vmem>>, vector<1x1xf32>,
    return
  }
  func.func @transform_0(%arg0: i32) -> (i32, i32) {
    %c0_i32 = arith.constant 0 : i32
    %c0_i32_0 = arith.constant 0 : i32
    %c0_i32_1 = arith.constant 0 : i32
    return %c0_i32, %c0_i32_0 : i32, i32
  }
  func.func @transform_1(%arg0: i32) -> (i32, i32) {
    %c0_i32 = arith.constant 0 : i32
    %c0_i32_0 = arith.constant 0 : i32
    %c0_i32_1 = arith.constant 0 : i32
    return %c0_i32, %c0_i32_0 : i32, i32
  }
  func.func @transform_2(%arg0: i32) -> (i32, i32) {
    %c0_i32 = arith.constant 0 : i32
    %c0_i32_0 = arith.constant 0 : i32
    return %c0_i32, %arg0 : i32, i32
  }
  func.func @transform_3(%arg0: i32) -> (i32, i32) {
    %c0_i32 = arith.constant 0 : i32
    %c0_i32_0 = arith.constant 0 : i32
    return %c0_i32, %arg0 : i32, i32
  }
  func.func @transform_4(%arg0: i32) -> (i32, i32) {
    %c0_i32 = arith.constant 0 : i32
    %c0_i32_0 = arith.constant 0 : i32
    %c0_i32_1 = arith.constant 0 : i32
    return %c0_i32, %c0_i32_0 : i32, i32
  }
  func.func @transform_5(%arg0: i32) -> (i32, i32) {
    %c0_i32 = arith.constant 0 : i32
    %c0_i32_0 = arith.constant 0 : i32
    return %c0_i32, %arg0 : i32, i32
  }
  func.func @transform_6(%arg0: i32) -> (i32, i32) {
    %c0_i32 = arith.constant 0 : i32
    %c0_i32_0 = arith.constant 0 : i32
    %c0_i32_1 = arith.constant 0 : i32
    return %c0_i32, %c0_i32_0 : i32, i32
  }
}

</mosaic_0001>

<bundles_post_ra>
// kernel: tpu_custom_call.1
= control target key start
LH: loop header
LB: loop body
LE: loop exit
PB: predicated region body
PF: predicated region fallthrough
CT: control target
= control target key end

     0   :  { %12 = vsyncpa [#allocation4], 0  ;;  %s665_s0 = inlined_call_operand.<no memory space> [shape: f32[1,1], index: 0, kind: input, shape index: {}]   ;;  %s666_s1 = inlined_call_operand.vmem [shape: f32[8,64], index: 1, kind: input, shape index: {}]   ;;  %s667_s2 = inlined_call_operand.hbm [shape: f32[64,256], index: 2, kind: input, shape index: {}]   ;;  %s668_s3 = inlined_call_operand.hbm [shape: f32[64,256], index: 3, kind: input, shape index: {}]   ;;  %s669_s4 = inlined_call_operand.vmem [shape: f32[64,8], index: 4, kind: input, shape index: {}]   ;;  %s670_s5 = inlined_call_operand.vmem [shape: f32[8,256], index: 5, kind: input, shape index: {}]   ;;  %s671_s6 = inlined_call_operand.hbm [shape: f32[1,1], index: 6, kind: output, shape index: {}]  }
   0x1   :  { %13 = vsyncpa [#allocation7], 0 }
   0x2   :  { %14 = vsyncpa [#allocation5], 0  ;;  %s509_s21 = smov [#allocation3]  }
   0x3   :  { %s24_s22 = sshll.u32 %s509_s21, 4  ;;  %s25_s22 = int_to_ptr.vmem [resolvable:$true] %s24_s22 }
   0x4   :  { %s451_s23 = scalar_lea.vmem %s25_s22, 2048  ;;  %p456_p1 = scmp.lt.s32.totalorder %s25_s22, %s25_s22 }
   0x5   :  { %p452_p0 = scmp.ne.s32.totalorder %s25_s22, %s451_s23  ;;  %p457_p2 = scmp.lt.s32.totalorder %s451_s23, %s451_s23 }
   0x7   :  { %p458_p3 = por %p457_p2, %p456_p1 }
   0x9   :  { %p459_p4 = pnand %p458_p3, %p452_p0 }
   0xb   :  { %462 = shalt.err (!%p459_p4)
}
   0xc   :  { %s510_s24 = smov 256   ;;  %s511_s25 = smov 16  }
   0xd   :  { %30 = dma.hbm_to_vmem [thread:$0]  %s667_s2, 2048, %s25_s22, [#allocation4], %s510_s24, %s510_s24, %s511_s25  }
   0xe   :  { %s512_s28 = smov [#allocation6]  }
   0xf   :  { %s36_s29 = sshll.u32 %s512_s28, 4  ;;  %s37_s29 = int_to_ptr.vmem [resolvable:$true] %s36_s29 }
  0x10   :  { %s471_s30 = scalar_lea.vmem %s37_s29, 2048  ;;  %p476_p6 = scmp.lt.s32.totalorder %s37_s29, %s37_s29 }
  0x11   :  { %p472_p5 = scmp.ne.s32.totalorder %s37_s29, %s471_s30  ;;  %p477_p7 = scmp.lt.s32.totalorder %s471_s30, %s471_s30 }
  0x13   :  { %p478_p8 = por %p477_p7, %p476_p6 }
  0x15   :  { %p479_p9 = pnand %p478_p8, %p472_p5 }
  0x17   :  { %482 = shalt.err (!%p479_p9)
}
  0x18   :  { %42 = dma.hbm_to_vmem [thread:$0]  %s668_s3, 2048, %s37_s29, [#allocation7], %s510_s24, %s510_s24, %s511_s25  }
  0x19   :  { %503 = dma.done.wait [#allocation4], 2048  }
  0x1a   :  { %504 = vsyncadd [#allocation4], 4294965248 }
  0x1b   :  { %505 = dma.done.wait [#allocation7], 2048  }
  0x1c   :  { %506 = vsyncadd [#allocation7], 4294965248  ;;  %v513_v0 = vmov 0.0   ;;  %v69_v1 = vld [vmem:[%s670_s5 + $0x8] sm:$0xff]  ;;  %v68_v2 = vld [vmem:[%s670_s5] sm:$0xff]  ;;  %vm70_vm0 = vcmask 64512   ;;  %v606_v11 = vstv %s665_s0 }
  0x1d   :  { %159 = vmatprep.mubr.f32.mxu0 %v513_v0  ;;  %326 = vmatprep.mubr.f32.mxu1 %v513_v0  ;;  %v60_v3 = vld [vmem:[%s669_s4] sm:$0xff]  ;;  %v61_v4 = vld [vmem:[%s669_s4 + $0x8] sm:$0xff]  ;;  %v62_v5 = vld [vmem:[%s669_s4 + $0x10] sm:$0xff]  ;;  %vm258_vm1 = vcmask 523264   ;;  %vm57_vm2 = vcmask 0   ;;  %s514_s7 = smov [#allocation8]  }
  0x1e   :  { %125 = vmatprep.subr.mxu0 %v69_v1  ;;  %v63_v6 = vld [vmem:[%s669_s4 + $0x18] sm:$0xff]  ;;  %v64_v7 = vld [vmem:[%s669_s4 + $0x20] sm:$0xff]  ;;  %v65_v8 = vld [vmem:[%s669_s4 + $0x28] sm:$0xff]  ;;  %58 = vst.msk [vmem:[#allocation8] sm:$0x1] %vm57_vm2, %v513_v0  ;;  %s414_s8 = sshll.u32 %s514_s7, 4  ;;  %s415_s8 = int_to_ptr.vmem [resolvable:$true] %s414_s8 }
  0x1f   :  { %126 = vmatpush1.msra.mxu0 %v68_v2  ;;  %v66_v9 = vld [vmem:[%s669_s4 + $0x30] sm:$0xff]  ;;  %v67_v10 = vld [vmem:[%s669_s4 + $0x38] sm:$0xff]  ;;  %v208_v13 = vld [vmem:[#allocation6] sm:$0xff]  ;;  %s483_s2 = scalar_lea.vmem %s415_s8, 16  ;;  %s487_s9 = scalar_lea.vmem %s415_s8, 32 }
  0x20   :  { %424 = vmatmul.mubr.msk.f32.vlgmr.msra.gmra.mxu0 %vm70_vm0, %v60_v3  ;;  %v209_v16 = vld [vmem:[#allocation6 + $0x8] sm:$0xff]  ;;  %v346_v19 = vld [vmem:[#allocation3] sm:$0xff]  ;;  %v210_v22 = vld [vmem:[#allocation6 + $0x10] sm:$0xff]  ;;  %p484_p10 = scmp.ne.s32.totalorder %s415_s8, %s483_s2  ;;  %p488_p11 = scmp.lt.s32.totalorder %s415_s8, %s415_s8 }
  0x21   :  { %165 = vmatprep.mubr.f32.mxu0 %v513_v0  ;;  %v347_v20 = vld [vmem:[#allocation3 + $0x8] sm:$0xff]  ;;  %v348_v25 = vld [vmem:[#allocation3 + $0x10] sm:$0xff]  ;;  %v211_v27 = vld [vmem:[#allocation6 + $0x18] sm:$0xff]  ;;  %p489_p12 = scmp.lt.s32.totalorder %s487_s9, %s483_s2 }
  0x22   :  { %v349_v32 = vld [vmem:[#allocation3 + $0x18] sm:$0xff]  ;;  %v212_v34 = vld [vmem:[#allocation6 + $0x20] sm:$0xff]  ;;  %v213_v41 = vld [vmem:[#allocation6 + $0x28] sm:$0xff] }
  0x23   :  { %v350_v39 = vld [vmem:[#allocation3 + $0x20] sm:$0xff]  ;;  %v351_v46 = vld [vmem:[#allocation3 + $0x28] sm:$0xff]  ;;  %v214_v48 = vld [vmem:[#allocation6 + $0x30] sm:$0xff]  ;;  %p490_p13 = por %p489_p12, %p488_p11 }
  0x24   :  { %425 = vmatmul.mubr.msk.f32.gmra.mxu0 %vm70_vm0, %v61_v4  ;;  %v352_v53 = vld [vmem:[#allocation3 + $0x30] sm:$0xff]  ;;  %v215_v55 = vld [vmem:[#allocation6 + $0x38] sm:$0xff]  ;;  %v216_v62 = vld [vmem:[#allocation6 + $0x40] sm:$0xff] }
  0x25   :  { %171 = vmatprep.mubr.f32.mxu0 %v513_v0  ;;  %v353_v60 = vld [vmem:[#allocation3 + $0x38] sm:$0xff]  ;;  %v354_v4 = vld [vmem:[#allocation3 + $0x40] sm:$0xff]  ;;  %p491_p0 = pnand %p490_p13, %p484_p10 }
  0x28   :  { %426 = vmatmul.mubr.msk.f32.gmra.mxu0 %vm70_vm0, %v62_v5 }
  0x29   :  { %177 = vmatprep.mubr.f32.mxu0 %v513_v0 }
  0x2c   :  { %427 = vmatmul.mubr.msk.f32.gmra.mxu0 %vm70_vm0, %v63_v6  ;;  %v217_v6 = vld [vmem:[#allocation6 + $0x48] sm:$0xff] }
  0x2d   :  { %183 = vmatprep.mubr.f32.mxu0 %v513_v0 }
  0x30   :  { %428 = vmatmul.mubr.msk.f32.gmra.mxu0 %vm70_vm0, %v64_v7 }
  0x31   :  { %189 = vmatprep.mubr.f32.mxu0 %v513_v0 }
  0x34   :  { %429 = vmatmul.mubr.msk.f32.gmra.mxu0 %vm70_vm0, %v65_v8 }
  0x35   :  { %195 = vmatprep.mubr.f32.mxu0 %v513_v0 }
  0x38   :  { %430 = vmatmul.mubr.msk.f32.gmra.mxu0 %vm70_vm0, %v66_v9 }
  0x39   :  { %201 = vmatprep.mubr.f32.mxu0 %v513_v0  ;;  %v403_v0 = vld [vmem:[#allocation8] sm:$0x1] }
  0x3c   :  { %431 = vmatmul.mubr.msk.f32.gmra.mxu0 %vm70_vm0, %v67_v10 }
  0xe0   :  { %v161_v12 = vpop.f32.mrf.mxu0 }
  0xe1   :  { %v225_v14 = vmul.f32 %v606_v11, %v161_v12  ;;  %v355_v12 = vld [vmem:[#allocation3 + $0x48] sm:$0xff] }
  0xe2   :  { %v163_v15 = vpop.f32.mrf.mxu0 }
  0xe3   :  { %v609_v17 = vsub.f32 %v208_v13, %v225_v14  ;;  %v226_v18 = vmul.f32 %v606_v11, %v163_v15  ;;  %v218_v14 = vld [vmem:[#allocation6 + $0x50] sm:$0xff] }
  0xe4   :  { %v167_v21 = vpop.f32.mrf.mxu0 }
  0xe5   :  { %v612_v23 = vsub.f32 %v209_v16, %v226_v18  ;;  %v227_v24 = vmul.f32 %v606_v11, %v167_v21  ;;  %v362_v28 = vmul.f32 %v346_v19, %v609_v17 }
  0xe6   :  { %v169_v26 = vpop.f32.mrf.mxu0 }
  0xe7   :  { %v363_v29 = vmul.f32 %v347_v20, %v612_v23  ;;  %v617_v30 = vsub.f32 %v210_v22, %v227_v24  ;;  %v228_v31 = vmul.f32 %v606_v11, %v169_v26  ;;  %v356_v20 = vld [vmem:[#allocation3 + $0x50] sm:$0xff]  ;;  %v219_v22 = vld [vmem:[#allocation6 + $0x58] sm:$0xff] }
  0xe8   :  { %v173_v33 = vpop.f32.mrf.mxu0 }
  0xe9   :  { %v378_v35 = vadd.f32 %v363_v29, %v362_v28  ;;  %v364_v36 = vmul.f32 %v348_v25, %v617_v30  ;;  %v621_v37 = vsub.f32 %v211_v27, %v228_v31  ;;  %v229_v38 = vmul.f32 %v606_v11, %v173_v33  ;;  %v357_v28 = vld [vmem:[#allocation3 + $0x58] sm:$0xff]  ;;  %v220_v31 = vld [vmem:[#allocation6 + $0x60] sm:$0xff] }
  0xea   :  { %v175_v40 = vpop.f32.mrf.mxu0 }
  0xeb   :  { %v379_v42 = vadd.f32 %v378_v35, %v364_v36  ;;  %v365_v43 = vmul.f32 %v349_v32, %v621_v37  ;;  %v625_v44 = vsub.f32 %v212_v34, %v229_v38  ;;  %v230_v45 = vmul.f32 %v606_v11, %v175_v40  ;;  %v358_v36 = vld [vmem:[#allocation3 + $0x60] sm:$0xff] }
  0xec   :  { %v179_v47 = vpop.f32.mrf.mxu0 }
  0xed   :  { %v380_v49 = vadd.f32 %v379_v42, %v365_v43  ;;  %v366_v50 = vmul.f32 %v350_v39, %v625_v44  ;;  %v629_v51 = vsub.f32 %v213_v41, %v230_v45  ;;  %v231_v52 = vmul.f32 %v606_v11, %v179_v47  ;;  %v221_v39 = vld [vmem:[#allocation6 + $0x68] sm:$0xff]  ;;  %v222_v47 = vld [vmem:[#allocation6 + $0x70] sm:$0xff] }
  0xee   :  { %v181_v54 = vpop.f32.mrf.mxu0  ;;  %v359_v45 = vld [vmem:[#allocation3 + $0x68] sm:$0xff] }
  0xef   :  { %v381_v56 = vadd.f32 %v380_v49, %v366_v50  ;;  %v367_v57 = vmul.f32 %v351_v46, %v629_v51  ;;  %v633_v58 = vsub.f32 %v214_v48, %v231_v52  ;;  %v232_v59 = vmul.f32 %v606_v11, %v181_v54  ;;  %v223_v54 = vld [vmem:[#allocation6 + $0x78] sm:$0xff] }
  0xf0   :  { %v185_v61 = vpop.f32.mrf.mxu0 }
  0xf1   :  { %v382_v63 = vadd.f32 %v381_v56, %v367_v57  ;;  %v368_v1 = vmul.f32 %v352_v53, %v633_v58  ;;  %v637_v2 = vsub.f32 %v215_v55, %v232_v59  ;;  %v233_v3 = vmul.f32 %v606_v11, %v185_v61  ;;  %v360_v55 = vld [vmem:[#allocation3 + $0x70] sm:$0xff]  ;;  %v361_v61 = vld [vmem:[#allocation3 + $0x78] sm:$0xff] }
  0xf2   :  { %v187_v5 = vpop.f32.mrf.mxu0 }
  0xf3   :  { %v383_v7 = vadd.f32 %v382_v63, %v368_v1  ;;  %v369_v8 = vmul.f32 %v353_v60, %v637_v2  ;;  %v249_v9 = vsub.f32 %v216_v62, %v233_v3  ;;  %v234_v10 = vmul.f32 %v606_v11, %v187_v5 }
  0xf4   :  { %v191_v13 = vpop.f32.mrf.mxu0 }
  0xf5   :  { %v384_v15 = vadd.f32 %v383_v7, %v369_v8  ;;  %v370_v16 = vmul.f32 %v354_v4, %v249_v9  ;;  %v250_v18 = vsub.f32 %v217_v6, %v234_v10  ;;  %v235_v19 = vmul.f32 %v606_v11, %v191_v13 }
  0xf6   :  { %v193_v21 = vpop.f32.mrf.mxu0 }
  0xf7   :  { %v385_v24 = vadd.f32 %v384_v15, %v370_v16  ;;  %v371_v25 = vmul.f32 %v355_v12, %v250_v18  ;;  %v251_v26 = vsub.f32 %v218_v14, %v235_v19  ;;  %v236_v27 = vmul.f32 %v606_v11, %v193_v21 }
  0xf8   :  { %v197_v29 = vpop.f32.mrf.mxu0 }
  0xf9   :  { %v386_v32 = vadd.f32 %v385_v24, %v371_v25  ;;  %v372_v33 = vmul.f32 %v356_v20, %v251_v26  ;;  %v252_v34 = vsub.f32 %v219_v22, %v236_v27  ;;  %v237_v35 = vmul.f32 %v606_v11, %v197_v29 }
  0xfa   :  { %v199_v38 = vpop.f32.mrf.mxu0 }
  0xfb   :  { %v387_v40 = vadd.f32 %v386_v32, %v372_v33  ;;  %v373_v41 = vmul.f32 %v357_v28, %v252_v34  ;;  %v253_v42 = vsub.f32 %v220_v31, %v237_v35  ;;  %v238_v43 = vmul.f32 %v606_v11, %v199_v38 }
  0xfc   :  { %v203_v46 = vpop.f32.mrf.mxu0 }
  0xfd   :  { %v388_v48 = vadd.f32 %v387_v40, %v373_v41  ;;  %v374_v49 = vmul.f32 %v358_v36, %v253_v42  ;;  %v254_v50 = vsub.f32 %v221_v39, %v238_v43  ;;  %v239_v52 = vmul.f32 %v606_v11, %v203_v46 }
  0xfe   :  { %v205_v53 = vpop.f32.mrf.mxu0 }
  0xff   :  { %v389_v56 = vadd.f32 %v388_v48, %v374_v49  ;;  %v375_v57 = vmul.f32 %v359_v45, %v254_v50  ;;  %v240_v59 = vmul.f32 %v606_v11, %v205_v53  ;;  %v255_v60 = vsub.f32 %v222_v47, %v239_v52  ;;  %v257_v11 = vld [vmem:[%s666_s1] sm:$0xff] }
 0x101   :  { %v256_v62 = vsub.f32 %v223_v54, %v240_v59  ;;  %v376_v63 = vmul.f32 %v360_v55, %v255_v60  ;;  %v390_v1 = vadd.f32 %v389_v56, %v375_v57 }
 0x103   :  { %278 = vmatprep.subr.mxu1 %v256_v62  ;;  %v377_v3 = vmul.f32 %v361_v61, %v256_v62  ;;  %v391_v4 = vadd.f32 %v390_v1, %v376_v63 }
 0x104   :  { %279 = vmatpush1.msra.mxu1 %v255_v60 }
 0x105   :  { %280 = vmatprep.subr.mxu1 %v254_v50  ;;  %v392_v5 = vadd.f32 %v391_v4, %v377_v3 }
 0x106   :  { %281 = vmatpush1.msra.mxu1 %v253_v42 }
 0x107   :  { %282 = vmatprep.subr.mxu1 %v252_v34 }
 0x108   :  { %283 = vmatpush1.msra.mxu1 %v251_v26 }
 0x109   :  { %284 = vmatprep.subr.mxu1 %v250_v18 }
 0x10a   :  { %285 = vmatpush1.msra.mxu1 %v249_v9 }
 0x10b   :  { %286 = vmatprep.subr.mxu1 %v637_v2 }
 0x10c   :  { %287 = vmatpush1.msra.mxu1 %v633_v58 }
 0x10d   :  { %288 = vmatprep.subr.mxu1 %v629_v51 }
 0x10e   :  { %289 = vmatpush1.msra.mxu1 %v625_v44 }
 0x10f   :  { %290 = vmatprep.subr.mxu1 %v621_v37 }
 0x110   :  { %291 = vmatpush1.msra.mxu1 %v617_v30 }
 0x111   :  { %292 = vmatprep.subr.mxu1 %v612_v23 }
 0x112   :  { %293 = vmatpush1.msra.mxu1 %v609_v17 }
 0x113   :  { %432 = vmatmul.mubr.msk.f32.vlgmr.msra.gmra.mxu1 %vm258_vm1, %v257_v11 }
 0x1d3   :  { %v328_v2 = vpop.f32.mrf.mxu1 }
 0x1d4   :  { %v333_v6 = vmul.f32 %v328_v2, %v328_v2 }
 0x1d5   :  { %v330_v58 = vpop.f32.mrf.mxu1 }
 0x1d6   :  { %v334_v51 = vmul.f32 %v330_v58, %v330_v58 }
 0x1d8   :  { %v335_v7 = vadd.f32 %v334_v51, %v333_v6 }
 0x1da   :  { %336 = vadd.xlane.f32.xlu0 %v335_v7 }
 0x1de   :  { %393 = vadd.xlane.f32.xlu0 %v392_v5 }
 0x263   :  { %v337_v30 = vpop.xlane.xlu0 %336 }
 0x264   :  { %v338_v37 = vrot.slane %v337_v30, 4 }
 0x266   :  { %v339_v44 = vadd.f32 %v338_v37, %v337_v30 }
 0x267   :  { %v394_v8 = vpop.xlane.xlu0 %393 }
 0x268   :  { %v340_v9 = vrot.slane %v339_v44, 2  ;;  %v395_v23 = vrot.slane %v394_v8, 4 }
 0x26a   :  { %v396_v10 = vadd.f32 %v395_v23, %v394_v8  ;;  %v341_v17 = vadd.f32 %v340_v9, %v339_v44 }
 0x26c   :  { %v397_v12 = vrot.slane %v396_v10, 2  ;;  %v342_v13 = vrot.slane %v341_v17, 1 }
 0x26e   :  { %v398_v14 = vadd.f32 %v397_v12, %v396_v10  ;;  %v343_v15 = vadd.f32 %v342_v13, %v341_v17 }
 0x270   :  { %433 = vpush %v343_v15  ;;  %v399_v16 = vrot.slane %v398_v14, 1 }
 0x272   :  { %v400_v18 = vadd.f32 %v399_v16, %v398_v14 }
 0x274   :  { %435 = vpush %v400_v18 }
 0x2a1   :  { %s434_s1 = spop %433 }
 0x2a2   :  { %s345_s28 = smul.f32 0.5, %s434_s1 }
 0x2a5   :  { %s436_s29 = spop %435 }
 0x2a6   :  { %s402_s30 = sadd.f32 %s436_s29, %s345_s28 }
 0x2a8   :  { %v404_v19 = vstv %s402_s30 }
 0x2a9   :  { %v405_v20 = vadd.f32 %v404_v19, %v403_v0 }
 0x2ab   :  { %407 = vst.msk [vmem:[#allocation8] sm:$0x1] %vm57_vm2, %v405_v20 }
 0x2ac   :  { %494 = shalt.err (!%p491_p0)
}
 0x2ad   :  { %417 = dma.vmem_to_hbm [thread:$0]  %s415_s8, 16, %s671_s6, [#allocation5]  }
 0x2ae   :  { %507 = dma.done.wait [#allocation5], 16  }
 0x2af   :  { %508 = vsyncadd [#allocation5], 4294967280 }
 0x2b0   :  { %421 = vsyncpa [#allocation4], 1 }
 0x2b1   :  { %422 = vsyncpa [#allocation7], 1 }
 0x2b2   :  { %423 = vsyncpa [#allocation5], 1 }

</bundles_post_ra>
